<compile_context>
chip_gen: v5e
topology: v5e:2x2
jax: 0.10.0
libtpu: 0.0.40
codegen_flags: <defaults>
</compile_context>

<pallas_src>
import jax
import jax.numpy as jnp
from jax.experimental import pallas as pl
from jax.experimental.pallas import tpu as pltpu


def channel_gate_kernel(x_ref, w1_ref, b1_ref, w2_ref, b2_ref, o_ref):
    # x_ref : (1, C, HW)   one batch sample (channels on sublanes, pixels on lanes)
    # w1_ref: (Ch, C)      Linear(gate_channels -> gate_channels // r) weight
    # b1_ref: (Ch, 1)
    # w2_ref: (C, Ch)      Linear(gate_channels // r -> gate_channels) weight
    # b2_ref: (C, 1)
    # o_ref : (1, C, HW)
    xv = x_ref[0]                                             # (C, HW)

    # Global average / max pool over the spatial (lane) axis -> (C, 1).
    avg = jnp.mean(xv, axis=1, keepdims=True)
    mx = jnp.max(xv, axis=1, keepdims=True)

    w1 = w1_ref[...]
    b1 = b1_ref[...]

    # Shared MLP, transposed layout (channels stay on sublanes).
    h_a = jnp.maximum(jnp.dot(w1, avg, preferred_element_type=jnp.float32) + b1, 0.0)
    h_m = jnp.maximum(jnp.dot(w1, mx, preferred_element_type=jnp.float32) + b1, 0.0)

    # mlp(avg) + mlp(max) == W2 @ (h_a + h_m) + 2*b2   (layer 2 is linear)
    att = (jnp.dot(w2_ref[...], h_a + h_m, preferred_element_type=jnp.float32)
           + 2.0 * b2_ref[...])                               # (C, 1)

    scale = 1.0 / (1.0 + jnp.exp(-att))                       # sigmoid, (C, 1)
    o_ref[0] = xv * scale                                     # broadcast over HW lanes


def channel_gate(x, w1, b1, w2, b2):
    """x: (N, C, H, W) float32. w1: (C//r, C), b1: (C//r,), w2: (C, C//r), b2: (C,)."""
    N, C, H, W = x.shape
    HW = H * W
    Ch = w1.shape[0]

    x_flat = x.reshape(N, C, HW)           # free reshape (H, W contiguous in NCHW)
    b1c = b1.reshape(Ch, 1)
    b2c = b2.reshape(C, 1)

    out = pl.pallas_call(
        channel_gate_kernel,
        out_shape=jax.ShapeDtypeStruct((N, C, HW), jnp.float32),
        grid_spec=pltpu.PrefetchScalarGridSpec(
            num_scalar_prefetch=0,
            grid=(N,),
            in_specs=[
                pl.BlockSpec((1, C, HW), lambda n: (n, 0, 0)),
                pl.BlockSpec((Ch, C), lambda n: (0, 0)),     # resident across grid
                pl.BlockSpec((Ch, 1), lambda n: (0, 0)),
                pl.BlockSpec((C, Ch), lambda n: (0, 0)),
                pl.BlockSpec((C, 1), lambda n: (0, 0)),
            ],
            out_specs=pl.BlockSpec((1, C, HW), lambda n: (n, 0, 0)),
        ),
        compiler_params=pltpu.CompilerParams(
            dimension_semantics=("parallel",)),               # shard batch on v7x megacore
    )(x_flat, w1, b1c, w2, b2c)
    return out.reshape(N, C, H, W)


# -------------------------- reference (pure jnp) ----------------------------

def channel_gate_ref(x, w1, b1, w2, b2):
    avg = jnp.mean(x, axis=(2, 3))                            # (N, C)
    mx = jnp.max(x, axis=(2, 3))                              # (N, C)

    def mlp(p):
        h = jnp.maximum(p @ w1.T + b1, 0.0)
        return h @ w2.T + b2

    att = mlp(avg) + mlp(mx)
    scale = jax.nn.sigmoid(att)[:, :, None, None]
    return x * scale


# --------------------------------- driver -----------------------------------

if __name__ == "__main__":
    N, C, H, W = 2, 64, 16, 16        # gate_channels=64, reduction_ratio=16 -> hidden=4
    reduction_ratio = 16
    Ch = C // reduction_ratio

    key = jax.random.PRNGKey(0)
    k = jax.random.split(key, 5)
    x = jax.random.normal(k[0], (N, C, H, W), jnp.float32)
    w1 = 0.2 * jax.random.normal(k[1], (Ch, C), jnp.float32)
    b1 = 0.1 * jax.random.normal(k[2], (Ch,), jnp.float32)
    w2 = 0.2 * jax.random.normal(k[3], (C, Ch), jnp.float32)
    b2 = 0.1 * jax.random.normal(k[4], (C,), jnp.float32)

    out = jax.block_until_ready(channel_gate(x, w1, b1, w2, b2))
    ref = channel_gate_ref(x, w1, b1, w2, b2)

    assert out.shape == (N, C, H, W), out.shape
    assert jnp.allclose(out, ref, rtol=2e-3, atol=2e-3), \
        float(jnp.max(jnp.abs(out - ref)))

    print("KERNEL_OK")
</pallas_src>

<mosaic_0001>
module attributes {stable_mosaic.version = 11 : i64} {
  func.func @channel_gate_kernel(%arg0: i32, %arg1: memref<1x64x256xf32, #tpu.memory_space<vmem>>, %arg2: memref<4x64xf32, #tpu.memory_space<vmem>>, %arg3: memref<4x1xf32, #tpu.memory_space<vmem>>, %arg4: memref<64x4xf32, #tpu.memory_space<vmem>>, %arg5: memref<64x1xf32, #tpu.memory_space<vmem>>, %arg6: memref<1x64x256xf32, #tpu.memory_space<vmem>>) attributes {dimension_semantics = [#tpu.dimension_semantics<parallel>], iteration_bounds = array<i64: 2>, scalar_prefetch = 0 : i64, scratch_operands = 0 : i64, tpu.core_type = #tpu.core_type<tc>, window_params = [{transform_indices = @transform_0, window_bounds = array<i64: 1, 64, 256>}, {pipeline_mode = #tpu.pipeline_mode<synchronous>, transform_indices = @transform_1, window_bounds = array<i64: 4, 64>}, {pipeline_mode = #tpu.pipeline_mode<synchronous>, transform_indices = @transform_2, window_bounds = array<i64: 4, 1>}, {pipeline_mode = #tpu.pipeline_mode<synchronous>, transform_indices = @transform_3, window_bounds = array<i64: 64, 4>}, {pipeline_mode = #tpu.pipeline_mode<synchronous>, transform_indices = @transform_4, window_bounds = array<i64: 64, 1>}, {transform_indices = @transform_5, window_bounds = array<i64: 1, 64, 256>}]} {
    %c0 = arith.constant 0 : index
    %c0_0 = arith.constant 0 : index
    %c0_1 = arith.constant 0 : index
    %0 = vector.load %arg1[%c0, %c0_0, %c0_1] : memref<1x64x256xf32, #tpu.memory_space<vmem>>, vector<1x64x256xf32>
    %1 = vector.shape_cast %0 : vector<1x64x256xf32> to vector<64x256xf32>
    %cst = arith.constant dense<0.000000e+00> : vector<64xf32>
    %2 = vector.multi_reduction <add>, %1, %cst [1] : vector<64x256xf32> to vector<64xf32>
    %3 = vector.shape_cast %2 : vector<64xf32> to vector<64x1xf32>
    %cst_2 = arith.constant 2.560000e+02 : f32
    %4 = vector.broadcast %cst_2 : f32 to vector<64x1xf32>
    %5 = arith.divf %3, %4 : vector<64x1xf32>
    %cst_3 = arith.constant dense<0xFF800000> : vector<64xf32>
    %6 = vector.multi_reduction <maximumf>, %1, %cst_3 [1] : vector<64x256xf32> to vector<64xf32>
    %7 = vector.shape_cast %6 : vector<64xf32> to vector<64x1xf32>
    %c0_4 = arith.constant 0 : index
    %c0_5 = arith.constant 0 : index
    %8 = vector.load %arg2[%c0_4, %c0_5] : memref<4x64xf32, #tpu.memory_space<vmem>>, vector<4x64xf32>
    %c0_6 = arith.constant 0 : index
    %c0_7 = arith.constant 0 : index
    %9 = vector.load %arg3[%c0_6, %c0_7] : memref<4x1xf32, #tpu.memory_space<vmem>>, vector<4x1xf32>
    %cst_8 = arith.constant dense<0.000000e+00> : vector<4x1xf32>
    %10 = tpu.matmul %8, %5, %cst_8 {dimension_numbers = #tpu.dot_dimension_numbers<[1], [0], [0], [1], [0, 0, 1, 1], [], []>} : vector<4x64xf32>, vector<64x1xf32>, vector<4x1xf32> -> vector<4x1xf32>
    %11 = arith.addf %10, %9 : vector<4x1xf32>
    %cst_9 = arith.constant 0.000000e+00 : f32
    %12 = vector.broadcast %cst_9 : f32 to vector<4x1xf32>
    %13 = arith.maximumf %11, %12 : vector<4x1xf32>
    %cst_10 = arith.constant dense<0.000000e+00> : vector<4x1xf32>
    %14 = tpu.matmul %8, %7, %cst_10 {dimension_numbers = #tpu.dot_dimension_numbers<[1], [0], [0], [1], [0, 0, 1, 1], [], []>} : vector<4x64xf32>, vector<64x1xf32>, vector<4x1xf32> -> vector<4x1xf32>
    %15 = arith.addf %14, %9 : vector<4x1xf32>
    %cst_11 = arith.constant 0.000000e+00 : f32
    %16 = vector.broadcast %cst_11 : f32 to vector<4x1xf32>
    %17 = arith.maximumf %15, %16 : vector<4x1xf32>
    %c0_12 = arith.constant 0 : index
    %c0_13 = arith.constant 0 : index
    %18 = vector.load %arg4[%c0_12, %c0_13] : memref<64x4xf32, #tpu.memory_space<vmem>>, vector<64x4xf32>
    %19 = arith.addf %13, %17 : vector<4x1xf32>
    %cst_14 = arith.constant dense<0.000000e+00> : vector<64x1xf32>
    %20 = tpu.matmul %18, %19, %cst_14 {dimension_numbers = #tpu.dot_dimension_numbers<[1], [0], [0], [1], [0, 0, 1, 1], [], []>} : vector<64x4xf32>, vector<4x1xf32>, vector<64x1xf32> -> vector<64x1xf32>
    %c0_15 = arith.constant 0 : index
    %c0_16 = arith.constant 0 : index
    %21 = vector.load %arg5[%c0_15, %c0_16] : memref<64x1xf32, #tpu.memory_space<vmem>>, vector<64x1xf32>
    %cst_17 = arith.constant 2.000000e+00 : f32
    %22 = vector.broadcast %cst_17 : f32 to vector<64x1xf32>
    %23 = arith.mulf %22, %21 : vector<64x1xf32>
    %24 = arith.addf %20, %23 : vector<64x1xf32>
    %cst_18 = arith.constant 0.000000e+00 : f32
    %25 = vector.broadcast %cst_18 : f32 to vector<64x1xf32>
    %26 = arith.subf %25, %24 : vector<64x1xf32>
    %27 = math.exp %26 : vector<64x1xf32>
    %cst_19 = arith.constant 1.000000e+00 : f32
    %28 = vector.broadcast %cst_19 : f32 to vector<64x1xf32>
    %29 = arith.addf %28, %27 : vector<64x1xf32>
    %cst_20 = arith.constant 1.000000e+00 : f32
    %30 = vector.broadcast %cst_20 : f32 to vector<64x1xf32>
    %31 = arith.divf %30, %29 : vector<64x1xf32>
    %32 = vector.broadcast %31 : vector<64x1xf32> to vector<64x256xf32>
    %33 = arith.mulf %1, %32 : vector<64x256xf32>
    %c0_21 = arith.constant 0 : index
    %c0_22 = arith.constant 0 : index
    %c0_23 = arith.constant 0 : index
    %34 = vector.load %arg6[%c0_21, %c0_22, %c0_23] : memref<1x64x256xf32, #tpu.memory_space<vmem>>, vector<1x64x256xf32>
    %35 = vector.shape_cast %34 : vector<1x64x256xf32> to vector<64x256xf32>
    %36 = vector.shape_cast %33 : vector<64x256xf32> to vector<1x64x256xf32>
    tpu.vector_store %arg6[%c0_21, %c0_22, %c0_23], %36 {strides = array<i32>} : memref<1x64x256xf32, #tpu.memory_space<vmem>>, vector<1x64x256xf32>,
    return
  }
  func.func @transform_0(%arg0: i32) -> (i32, i32, i32) {
    %c0_i32 = arith.constant 0 : i32
    %c0_i32_0 = arith.constant 0 : i32
    %c0_i32_1 = arith.constant 0 : i32
    return %arg0, %c0_i32, %c0_i32_0 : i32, i32, i32
  }
  func.func @transform_1(%arg0: i32) -> (i32, i32) {
    %c0_i32 = arith.constant 0 : i32
    %c0_i32_0 = arith.constant 0 : i32
    %c0_i32_1 = arith.constant 0 : i32
    return %c0_i32, %c0_i32_0 : i32, i32
  }
  func.func @transform_2(%arg0: i32) -> (i32, i32) {
    %c0_i32 = arith.constant 0 : i32
    %c0_i32_0 = arith.constant 0 : i32
    %c0_i32_1 = arith.constant 0 : i32
    return %c0_i32, %c0_i32_0 : i32, i32
  }
  func.func @transform_3(%arg0: i32) -> (i32, i32) {
    %c0_i32 = arith.constant 0 : i32
    %c0_i32_0 = arith.constant 0 : i32
    %c0_i32_1 = arith.constant 0 : i32
    return %c0_i32, %c0_i32_0 : i32, i32
  }
  func.func @transform_4(%arg0: i32) -> (i32, i32) {
    %c0_i32 = arith.constant 0 : i32
    %c0_i32_0 = arith.constant 0 : i32
    %c0_i32_1 = arith.constant 0 : i32
    return %c0_i32, %c0_i32_0 : i32, i32
  }
  func.func @transform_5(%arg0: i32) -> (i32, i32, i32) {
    %c0_i32 = arith.constant 0 : i32
    %c0_i32_0 = arith.constant 0 : i32
    %c0_i32_1 = arith.constant 0 : i32
    return %arg0, %c0_i32, %c0_i32_0 : i32, i32, i32
  }
}

</mosaic_0001>

<bundles_post_ra>
// kernel: tpu_custom_call.1
= control target key start
LH: loop header
LB: loop body
LE: loop exit
PB: predicated region body
PF: predicated region fallthrough
CT: control target
= control target key end

     0   :  { %10 = vsyncpa [#allocation3], 0  ;;  %s1424_s0 = inlined_call_operand.hbm [shape: f32[2,64,256], index: 0, kind: input, shape index: {}]   ;;  %s1425_s1 = inlined_call_operand.vmem [shape: f32[4,64], index: 1, kind: input, shape index: {}]   ;;  %s1426_s2 = inlined_call_operand.vmem [shape: f32[4,1], index: 2, kind: input, shape index: {}]   ;;  %s1427_s3 = inlined_call_operand.vmem [shape: f32[64,4], index: 3, kind: input, shape index: {}]   ;;  %s1428_s4 = inlined_call_operand.vmem [shape: f32[64,1], index: 4, kind: input, shape index: {}]   ;;  %s1429_s5 = inlined_call_operand.hbm [shape: f32[2,64,256], index: 5, kind: output, shape index: {}]  }
   0x1   :  { %12 = vsyncpa [#allocation3 + $0x1], 0 }
   0x2   :  { %13 = vsyncpa [#allocation4], 0 }
   0x3   :  { %15 = vsyncpa [#allocation4 + $0x1], 0  ;;  %s1031_s18 = smov 0   ;;  %s1033_s19 = smov 0  }
   0x4   :  { %s1035_s20 = smov 0   ;;  %s1037_s21 = smov 0  }
   0x5 LB: > { %s1052_s22 = sadd.s32 4294967295, %s993_s21   ;;  %s780_s23 = sadd.s32 4294967294, %s993_s21   ;;  %s993_s21 = sphi %s1037_s21, %s1445_s21   ;;  %s989_s20 = sphi %s1035_s20, %s1444_s20   ;;  %s985_s19 = sphi %s1033_s19, %s1443_s19   ;;  %s981_s18 = sphi %s1031_s18, %s1442_s18  }
   0x6   : > { %s1056_s24 = sadd.s32 1, %s993_s21   ;;  %s28_s25 = sadd.s32 1, %s989_s20 }
   0x7   : > { %s25_s26 = ssub.s32 %s993_s21, %s1056_s24  ;;  %p35_p0 = scmp.ne.s32.totalorder %s989_s20, %s985_s19 }
   0x8   : > { %p26_p1 = scmp.eq.s32.totalorder %s25_s26, 0  ;;  %p36_p2 = scmp.eq.s32.totalorder %s993_s21, 0 }
   0x9   : > { %p41_p3 = scmp.ne.s32.totalorder %s985_s19, %s981_s18  ;;  %p42_p4 = scmp.eq.s32.totalorder %s1052_s22, 0 }
   0xa   : > { %s1068_s27 = scalar_select %p26_p1, %s989_s20, %s28_s25  }
   0xb   : > { %p1070_p5 = por %p36_p2, %p35_p0  ;;  %p1074_p6 = por %p42_p4, %p41_p3 }
   0xc   : > { %p149_p7 = scmp.eq.s32.totalorder %s1052_s22, 1  ;;  %p155_p8 = scmp.eq.s32.totalorder %s780_s23, 1 }
   0xd   : > { %p820_p10 = scmp.lt.s32.totalorder %s993_s21, 2  ;;  %s187_s7 = sand.u32 1, %s989_s20  }
   0xe   : > { %p1081_p11 = por %p149_p7, %p35_p0  ;;  %p1085_p12 = por %p155_p8, %p41_p3 }
   0xf   : > { %s805_s8 = sshll.u32 %s993_s21, 7  ;;  %s783_s9 = sshll.u32 %s187_s7, 7 }
  0x10   : > { %s196_s12 = scalar_lea.hbm %s1424_s0, %s805_s8  ;;  %s191_s14 = scalar_lea.vmem [#allocation2], %s783_s9 }
  0x11   : > { %s197_s13 = sshll.u32 %s196_s12, 4  ;;  %s199_s15 = sshll.u32 %s191_s14, 4  ;;  %s198_s13 = int_to_ptr.hbm [resolvable:$true] %s197_s13  ;;  %s200_s15 = int_to_ptr.vmem [resolvable:$true] %s199_s15 }
  0x12   : > { %p1096_p13 = pnand %p820_p10, %p1070_p5  ;;  %p786_p0 = scmp.ge.s32.totalorder %s993_s21, 1 }
  0x13   : > { %p207_p1 = scmp.lt.s32.totalorder %s993_s21, 3  ;;  %s188_s17 = scalar_lea.sflag [#allocation3], %s187_s7 }
  0x14   : > { %s897_s23 = sshra.s32 %s198_s13, 4  ;;  %p901_p3 = pneg %p1096_p13  ;;  %s898_s23 = int_to_ptr.hbm [resolvable:$true] %s897_s23 }
  0x15   : > { %s899_s25 = scalar_lea.hbm %s898_s23, 128  ;;  %s904_s28 = scalar_lea.hbm %s1424_s0, 256 }
  0x16   : > { %p900_p2 = scmp.ne.s32.totalorder %s898_s23, %s899_s25  ;;  %p905_p5 = scmp.lt.s32.totalorder %s898_s23, %s1424_s0 }
  0x17   : > { %p906_p8 = scmp.lt.s32.totalorder %s904_s28, %s899_s25 }
  0x18   : > { %p902_p4 = pnand %p901_p3, %p900_p2 }
  0x19   : > { %p907_p10 = por %p906_p8, %p905_p5 }
  0x1a   : > { %p903_p7 = pneg %p902_p4 }
  0x1c   : > { %p908_p9 = pnand %p907_p10, %p903_p7 }
  0x1e   : > { %911 = shalt.err (!%p908_p9)
}
  0x1f   : > { %s995_s7 = smov 256   ;;  %s996_s11 = smov 16  }
  0x20   : > { %815 = dma.hbm_to_vmem [thread:$0]  (!%p1096_p13), %s198_s13, 2048, %s200_s15, %s188_s17, %s995_s7, %s995_s7, %s996_s11  }
  0x21   : > { %p208_p2 = pnand %p786_p0, %p207_p1 }
  0x22   : > { %s1117_s12 = sand.u32 (!%p208_p2), 1, %s985_s19  }
  0x23   : > { %211 = sbr.rel (%p208_p2) target bundleno = 638 (0x27e), region = 40  ;;  %s787_s14 = sshll.u32 (!%p208_p2), %s1117_s12, 7 }
  0x24   : > { %s214_s23 = scalar_lea.sflag (!%p208_p2), [#allocation3], %s1117_s12  ;;  %s1123_s25 = scalar_lea.vmem (!%p208_p2), [#allocation2], %s787_s14 }
  0x28   : > { %972 = dma.done.wait (%p1074_p6), %s214_s23, 2048  }
  0x29   : > { %974 = vsyncadd (%p1074_p6), %s214_s23, 4294965248  ;;  %v1130_v0 = vld [vmem:[%s1123_s25 + $0x70] sm:$0xff]  ;;  %v1133_v1 = vld [vmem:[%s1123_s25 + $0x78] sm:$0xff]  ;;  %v997_v32 = vmov 256.0   ;;  %vm326_vm1 = vcmask 523264   ;;  %vm422_vm2 = vcmask 1043456  }
  0x2a   : > { %v1136_v2 = vld [vmem:[%s1123_s25 + $0x60] sm:$0xff]  ;;  %v282_v3 = vadd.f32 %v1133_v1, %v1130_v0  ;;  %v321_v4 = vmax.f32 %v1130_v0, %v1133_v1  ;;  %v1143_v5 = vld [vmem:[%s1123_s25 + $0x68] sm:$0xff]  ;;  %v1148_v7 = vld [vmem:[%s1123_s25 + $0x50] sm:$0xff]  ;;  %863 = vrcp.f32 %v997_v32  ;;  %vm397_vm3 = vcmask 31744   ;;  %s1358_s9 = scalar_lea.vmem [#allocation5], %s787_s14  ;;  %s806_s14 = sshll.u32 %s1052_s22, 7 }
  0x2b   : > { %v318_v6 = vmax.f32 %v1136_v2, %v1143_v5  ;;  %v1151_v8 = vld [vmem:[%s1123_s25 + $0x58] sm:$0xff]  ;;  %v1154_v9 = vld [vmem:[%s1123_s25 + $0x40] sm:$0xff]  ;;  %v1157_v10 = vld [vmem:[%s1123_s25 + $0x48] sm:$0xff]  ;;  %v279_v11 = vadd.f32 %v1143_v5, %v1136_v2  ;;  %s703_s11 = scalar_lea.hbm %s1429_s5, %s806_s14  ;;  %s704_s23 = sshll.u32 %s1358_s9, 4  ;;  %s705_s23 = int_to_ptr.vmem [resolvable:$true] %s704_s23 }
  0x2c   : > { %283 = vadd.xlane.f32.xlu0 %v282_v3  ;;  %322 = vmax.xlane.f32.xlu1 %v321_v4  ;;  %v276_v12 = vadd.f32 %v1151_v8, %v1148_v7  ;;  %v273_v13 = vadd.f32 %v1157_v10, %v1154_v9  ;;  %v1166_v14 = vld [vmem:[%s1123_s25 + $0x30] sm:$0xff]  ;;  %v1169_v15 = vld [vmem:[%s1123_s25 + $0x38] sm:$0xff]  ;;  %v315_v16 = vmax.f32 %v1148_v7, %v1151_v8  ;;  %v1178_v19 = vld [vmem:[%s1123_s25 + $0x20] sm:$0xff]  ;;  %s692_s22 = scalar_lea.sflag [#allocation4], %s1117_s12  ;;  %s947_s17 = scalar_lea.hbm %s1429_s5, 256 }
  0x2d   : > { %319 = vmax.xlane.f32.xlu2 %v318_v6  ;;  %v270_v17 = vadd.f32 %v1169_v15, %v1166_v14  ;;  %v312_v18 = vmax.f32 %v1154_v9, %v1157_v10  ;;  %v1181_v20 = vld [vmem:[%s1123_s25 + $0x28] sm:$0xff]  ;;  %v1184_v21 = vld [vmem:[%s1123_s25 + $0x10] sm:$0xff]  ;;  %v1187_v22 = vld [vmem:[%s1123_s25 + $0x18] sm:$0xff]  ;;  %v309_v24 = vmax.f32 %v1166_v14, %v1169_v15 }
  0x2e   : > { %v267_v23 = vadd.f32 %v1181_v20, %v1178_v19  ;;  %v264_v25 = vadd.f32 %v1187_v22, %v1184_v21  ;;  %v1196_v26 = vld [vmem:[%s1123_s25] sm:$0xff]  ;;  %v1199_v27 = vld [vmem:[%s1123_s25 + $0x8] sm:$0xff]  ;;  %v306_v28 = vmax.f32 %v1178_v19, %v1181_v20  ;;  %v303_v30 = vmax.f32 %v1184_v21, %v1187_v22  ;;  %s706_s25 = sshll.u32 %s703_s11, 4  ;;  %s707_s25 = int_to_ptr.hbm [resolvable:$true] %s706_s25 }
  0x2f   : > { %v261_v29 = vadd.f32 %v1199_v27, %v1196_v26  ;;  %v300_v31 = vmax.f32 %v1196_v26, %v1199_v27  ;;  %v324_v62 = vld [vmem:[%s1425_s1] sm:$0xf]  ;;  %s941_s29 = sshra.s32 %s707_s25, 4  ;;  %s942_s29 = int_to_ptr.hbm [resolvable:$true] %s941_s29 }
  0x30   : > { %v864_v33 = vpop.eup %863  ;;  %v325_v3 = vld [vmem:[%s1426_s2] sm:$0xf]  ;;  %s943_s13 = scalar_lea.hbm %s942_s29, 128  ;;  %p948_p0 = scmp.lt.s32.totalorder %s942_s29, %s1429_s5 }
  0x31   : > { %v286_v34 = vmul.f32 256.0, %v864_v33  ;;  %vm290_vm0 = vweird.f32 %v864_v33  ;;  %v381_v32 = vld [vmem:[%s1428_s4] sm:$0xff]  ;;  %p944_p6 = scmp.ne.s32.totalorder %s942_s29, %s943_s13  ;;  %p949_p1 = scmp.lt.s32.totalorder %s947_s17, %s943_s13 }
  0x33   : > { %v287_v35 = vsub.f32 1.0, %v286_v34  ;;  %v389_v34 = vmul.f32 2.0, %v381_v32  ;;  %p945_p9 = pnand %p944_p6, %p1081_p11  ;;  %p950_p3 = por %p949_p1, %p948_p0 }
  0x34   : > { %280 = vadd.xlane.f32.xlu0 %v279_v11  ;;  %277 = vadd.xlane.f32.xlu1 %v276_v12 }
  0x35   : > { %274 = vadd.xlane.f32.xlu2 %v273_v13  ;;  %v288_v36 = vmul.f32 %v864_v33, %v287_v35  ;;  %p946_p13 = pneg %p945_p9 }
  0x37   : > { %v289_v37 = vadd.f32 %v864_v33, %v288_v36  ;;  %p951_p4 = pnand %p950_p3, %p946_p13 }
  0x39   : > { %v291_v38 = vsel %vm290_vm0, %v864_v33, %v289_v37  ;;  %v385_v33 = vld [vmem:[%s1428_s4 + $0x20] sm:$0xff] }
  0x3a   : > { %v393_v35 = vmul.f32 2.0, %v385_v33 }
  0x3c   : > { %316 = vmax.xlane.f32.xlu0 %v315_v16  ;;  %271 = vadd.xlane.f32.xlu1 %v270_v17 }
  0x3d   : > { %313 = vmax.xlane.f32.xlu2 %v312_v18  ;;  %v372_v18 = vld [vmem:[%s1427_s3] sm:$0xff] }
  0x44   : > { %268 = vadd.xlane.f32.xlu0 %v267_v23  ;;  %310 = vmax.xlane.f32.xlu1 %v309_v24  ;;  %v376_v23 = vld [vmem:[%s1427_s3 + $0x20] sm:$0xff]  ;;  %v373_v24 = vld [vmem:[%s1427_s3 + $0x8] sm:$0xff] }
  0x45   : > { %265 = vadd.xlane.f32.xlu2 %v264_v25  ;;  %v377_v25 = vld [vmem:[%s1427_s3 + $0x28] sm:$0xff] }
  0x4c   : > { %307 = vmax.xlane.f32.xlu0 %v306_v28  ;;  %262 = vadd.xlane.f32.xlu1 %v261_v29  ;;  %v374_v28 = vld [vmem:[%s1427_s3 + $0x10] sm:$0xff] }
  0x4d   : > { %304 = vmax.xlane.f32.xlu2 %v303_v30  ;;  %v378_v29 = vld [vmem:[%s1427_s3 + $0x30] sm:$0xff]  ;;  %v375_v30 = vld [vmem:[%s1427_s3 + $0x18] sm:$0xff] }
  0x54   : > { %301 = vmax.xlane.f32.xlu0 %v300_v31  ;;  %v379_v31 = vld [vmem:[%s1427_s3 + $0x38] sm:$0xff] }
  0x9f   : > { %v284_v39 = vpop.xlane.xlu0 %283  ;;  %v323_v40 = vpop.xlane.xlu1 %322 }
  0xa0   : > { %v299_v41 = vmul.f32 %v291_v38, %v284_v39  ;;  %359 = vmatpush.msra.mxu1 %v323_v40  ;;  %v320_v42 = vpop.xlane.xlu2 %319  ;;  %v382_v40 = vld [vmem:[%s1428_s4 + $0x8] sm:$0xff] }
  0xa2   : > { %338 = vmatpush.msra.mxu0 %v299_v41  ;;  %360 = vmatpush.msra.mxu1 %v320_v42  ;;  %v386_v41 = vld [vmem:[%s1428_s4 + $0x28] sm:$0xff] }
  0xa7   : > { %v281_v43 = vpop.xlane.xlu0 %280  ;;  %v278_v44 = vpop.xlane.xlu1 %277 }
  0xa8   : > { %v298_v45 = vmul.f32 %v291_v38, %v281_v43  ;;  %v297_v46 = vmul.f32 %v291_v38, %v278_v44  ;;  %v275_v47 = vpop.xlane.xlu2 %274  ;;  %v998_v44 = vmov 0  }
  0xa9   : > { %v296_v48 = vmul.f32 %v291_v38, %v275_v47  ;;  %860 = vset.pattern.permute.xlu1 %v998_v44  ;;  %861 = vset.pattern.permute.xlu2 %v998_v44  ;;  %v390_v47 = vmul.f32 2.0, %v382_v40 }
  0xaa   : > { %339 = vmatpush.msra.mxu0 %v298_v45  ;;  %862 = vset.pattern.permute.xlu0 %v998_v44 }
  0xac   : > { %340 = vmatpush.msra.mxu0 %v297_v46 }
  0xae   : > { %341 = vmatpush.msra.mxu0 %v296_v48  ;;  %v394_v48 = vmul.f32 2.0, %v386_v41 }
  0xaf   : > { %v317_v49 = vpop.xlane.xlu0 %316  ;;  %v272_v50 = vpop.xlane.xlu1 %271 }
  0xb0   : > { %361 = vmatpush.msra.mxu1 %v317_v49  ;;  %v314_v51 = vpop.xlane.xlu2 %313  ;;  %v295_v52 = vmul.f32 %v291_v38, %v272_v50 }
  0xb2   : > { %362 = vmatpush.msra.mxu1 %v314_v51  ;;  %342 = vmatpush.msra.mxu0 %v295_v52 }
  0xb7   : > { %v269_v53 = vpop.xlane.xlu0 %268  ;;  %v311_v54 = vpop.xlane.xlu1 %310 }
  0xb8   : > { %v294_v55 = vmul.f32 %v291_v38, %v269_v53  ;;  %v266_v56 = vpop.xlane.xlu2 %265  ;;  %363 = vmatpush.msra.mxu1 %v311_v54  ;;  %v383_v53 = vld [vmem:[%s1428_s4 + $0x10] sm:$0xff] }
  0xb9   : > { %v293_v57 = vmul.f32 %v291_v38, %v266_v56  ;;  %v387_v54 = vld [vmem:[%s1428_s4 + $0x30] sm:$0xff] }
  0xba   : > { %343 = vmatpush.msra.mxu0 %v294_v55 }
  0xbc   : > { %344 = vmatpush.msra.mxu0 %v293_v57 }
  0xbf   : > { %v308_v58 = vpop.xlane.xlu0 %307  ;;  %v263_v59 = vpop.xlane.xlu1 %262 }
  0xc0   : > { %364 = vmatpush.msra.mxu1 %v308_v58  ;;  %v305_v60 = vpop.xlane.xlu2 %304  ;;  %v292_v61 = vmul.f32 %v291_v38, %v263_v59  ;;  %v391_v59 = vmul.f32 2.0, %v383_v53 }
  0xc2   : > { %365 = vmatpush.msra.mxu1 %v305_v60  ;;  %345 = vmatpush.msra.mxu0 %v292_v61  ;;  %v395_v60 = vmul.f32 2.0, %v387_v54 }
  0xc3   : > { %789 = vmatmul.msk.f32.vlgmr.msra.gmra.mxu0 %vm326_vm1, %v324_v62 }
  0xc7   : > { %v302_v63 = vpop.xlane.xlu0 %301 }
  0xc8   : > { %366 = vmatpush.msra.mxu1 %v302_v63 }
  0xc9   : > { %790 = vmatmul.msk.f32.vlgmr.msra.gmra.mxu1 %vm326_vm1, %v324_v62 }
 0x140   : > { %v347_v4 = vpop.f32.mrf.mxu0 }
 0x141   : > { %v348_v6 = vadd.f32 %v347_v4, %v325_v3 }
 0x143   : > { %v350_v12 = vmax.f32 %v348_v6, 0.0 }
 0x146   : > { %v368_v11 = vpop.f32.mrf.mxu1 }
 0x147   : > { %v369_v13 = vadd.f32 %v368_v11, %v325_v3 }
 0x149   : > { %v371_v16 = vmax.f32 %v369_v13, 0.0  ;;  %v384_v13 = vld [vmem:[%s1428_s4 + $0x18] sm:$0xff] }
 0x14b   : > { %v380_v17 = vadd.f32 %v371_v16, %v350_v12  ;;  %v388_v16 = vld [vmem:[%s1428_s4 + $0x38] sm:$0xff] }
 0x14d   : > { %791 = vmatpush.msk.msra.mxu2 %vm422_vm2, %v380_v17  ;;  %807 = vmatpush.msk.msra.mxu3 %vm422_vm2, %v380_v17 }
 0x14e   : > { %792 = vmatmul.msk.f32.vlgmr.msra.gmra.mxu2 %vm397_vm3, %v372_v18  ;;  %796 = vmatmul.msk.f32.vlgmr.msra.gmra.mxu3 %vm397_vm3, %v376_v23 }
 0x156   : > { %793 = vmatmul.msk.f32.gmra.mxu2 %vm397_vm3, %v373_v24  ;;  %797 = vmatmul.msk.f32.gmra.mxu3 %vm397_vm3, %v377_v25 }
 0x15e   : > { %794 = vmatmul.msk.f32.gmra.mxu2 %vm397_vm3, %v374_v28  ;;  %798 = vmatmul.msk.f32.gmra.mxu3 %vm397_vm3, %v378_v29  ;;  %v392_v28 = vmul.f32 2.0, %v384_v13  ;;  %v396_v29 = vmul.f32 2.0, %v388_v16 }
 0x166   : > { %795 = vmatmul.msk.f32.gmra.mxu2 %vm397_vm3, %v375_v30  ;;  %799 = vmatmul.msk.f32.gmra.mxu3 %vm397_vm3, %v379_v31 }
 0x1d1   : > { %v443_v36 = vpop.f32.mrf.mxu2  ;;  %v455_v37 = vpop.f32.mrf.mxu3 }
 0x1d2   : > { %v444_v38 = vadd.f32 %v443_v36, %v389_v34  ;;  %v456_v39 = vadd.f32 %v455_v37, %v393_v35 }
 0x1d4   : > { %v467_v42 = vsub.f32 0.0, %v444_v38  ;;  %v471_v43 = vsub.f32 0.0, %v456_v39 }
 0x1d6   : > { %v475_v45 = vmul.f32 1.442695, %v467_v42  ;;  %v483_v46 = vmul.f32 1.442695, %v471_v43 }
 0x1d8   : > { %865 = vpow2.f32 %v475_v45 }
 0x1d9   : > { %867 = vpow2.f32 %v483_v46  ;;  %v446_v49 = vpop.f32.mrf.mxu2  ;;  %v458_v50 = vpop.f32.mrf.mxu3 }
 0x1da   : > { %v447_v51 = vadd.f32 %v446_v49, %v390_v47  ;;  %v459_v52 = vadd.f32 %v458_v50, %v394_v48 }
 0x1dc   : > { %v468_v55 = vsub.f32 0.0, %v447_v51  ;;  %v472_v56 = vsub.f32 0.0, %v459_v52 }
 0x1de   : > { %v866_v57 = vpop.eup %865  ;;  %v477_v58 = vmul.f32 1.442695, %v468_v55  ;;  %v485_v63 = vmul.f32 1.442695, %v472_v56 }
 0x1df   : > { %v868_v61 = vpop.eup %867  ;;  %v491_v62 = vadd.f32 1.0, %v866_v57 }
 0x1e0   : > { %v1265_v3 = vadd.f32 1.0, %v868_v61  ;;  %869 = vpow2.f32 %v477_v58 }
 0x1e1   : > { %871 = vrcp.f32 %v491_v62  ;;  %v449_v4 = vpop.f32.mrf.mxu2  ;;  %v461_v6 = vpop.f32.mrf.mxu3  ;;  %v508_v41 = vand.u32 2147483647, %v491_v62  ;;  %v510_v45 = vand.u32 2147483648, %v491_v62  ;;  %vm504_vm5 = vweird.f32 %v491_v62 }
 0x1e2   : > { %873 = vrcp.f32 %v1265_v3  ;;  %v450_v11 = vadd.f32 %v449_v4, %v391_v59  ;;  %v462_v12 = vadd.f32 %v461_v6, %v395_v60  ;;  %v568_v58 = vand.u32 2147483647, %v1265_v3 }
 0x1e3   : > { %875 = vpow2.f32 %v485_v63  ;;  %vm509_vm6 = vcmp.eq.f32.partialorder %v508_v41, 8.507059e+37  ;;  %v511_v56 = vor.u32 1.1754944e-38, %v510_v45  ;;  %vm564_vm10 = vweird.f32 %v1265_v3 }
 0x1e4   : > { %v469_v17 = vsub.f32 0.0, %v450_v11  ;;  %v473_v18 = vsub.f32 0.0, %v462_v12  ;;  %v570_v12 = vand.u32 2147483648, %v1265_v3  ;;  %vm1309_vm12 = vcmp.eq.f32.partialorder %v568_v58, 8.507059e+37 }
 0x1e6   : > { %v870_v23 = vpop.eup %869  ;;  %v479_v24 = vmul.f32 1.442695, %v469_v17  ;;  %v487_v25 = vmul.f32 1.442695, %v473_v18 }
 0x1e7   : > { %v872_v30 = vpop.eup %871  ;;  %v1274_v31 = vadd.f32 1.0, %v870_v23 }
 0x1e8   : > { %v1276_v32 = vpop.eup %873  ;;  %877 = vpow2.f32 %v479_v24  ;;  %v500_v33 = vmul.f32 %v872_v30, %v491_v62  ;;  %vm505_vm4 = vweird.f32 %v872_v30 }
 0x1e9   : > { %v876_v34 = vpop.eup %875  ;;  %879 = vrcp.f32 %v1274_v31  ;;  %v452_v35 = vpop.f32.mrf.mxu2  ;;  %v560_v42 = vmul.f32 %v1276_v32, %v1265_v3  ;;  %vm506_vm7 = vmor %vm504_vm5, %vm505_vm4  ;;  %vm565_vm8 = vweird.f32 %v1276_v32  ;;  %v523_v6 = vand.u32 2147483647, %v1274_v31 }
 0x1ea   : > { %v464_v36 = vpop.f32.mrf.mxu3  ;;  %v1279_v37 = vadd.f32 1.0, %v876_v34  ;;  %881 = vpow2.f32 %v487_v25  ;;  %v453_v38 = vadd.f32 %v452_v35, %v392_v28  ;;  %v501_v40 = vsub.f32 1.0, %v500_v33  ;;  %vm1305_vm11 = vmor %vm564_vm10, %vm565_vm8 }
 0x1eb   : > { %v465_v39 = vadd.f32 %v464_v36, %v396_v29  ;;  %v561_v47 = vsub.f32 1.0, %v560_v42  ;;  %v525_v11 = vand.u32 2147483648, %v1274_v31  ;;  %vm519_vm13 = vweird.f32 %v1274_v31 }
 0x1ec   : > { %883 = vrcp.f32 %v1279_v37  ;;  %v470_v43 = vsub.f32 0.0, %v453_v38  ;;  %v502_v46 = vmul.f32 %v872_v30, %v501_v40  ;;  %vm524_vm15 = vcmp.eq.f32.partialorder %v523_v6, 8.507059e+37 }
 0x1ed   : > { %v474_v44 = vsub.f32 0.0, %v465_v39  ;;  %v562_v54 = vmul.f32 %v1276_v32, %v561_v47  ;;  %v571_v33 = vor.u32 1.1754944e-38, %v570_v12  ;;  %v585_v47 = vand.u32 2147483648, %v1279_v37 }
 0x1ee   : > { %v878_v48 = vpop.eup %877  ;;  %v481_v49 = vmul.f32 1.442695, %v470_v43  ;;  %v503_v53 = vadd.f32 %v872_v30, %v502_v46  ;;  %vm579_vm2 = vweird.f32 %v1279_v37 }
 0x1ef   : > { %v489_v50 = vmul.f32 1.442695, %v474_v44  ;;  %v880_v51 = vpop.eup %879  ;;  %v1284_v52 = vadd.f32 1.0, %v878_v48  ;;  %v563_v4 = vadd.f32 %v1276_v32, %v562_v54 }
 0x1f0   : > { %v882_v55 = vpop.eup %881  ;;  %885 = vpow2.f32 %v481_v49  ;;  %v515_v57 = vmul.f32 %v880_v51, %v1274_v31  ;;  %v507_v60 = vsel %vm506_vm7, %v872_v30, %v503_v53  ;;  %vm520_vm9 = vweird.f32 %v880_v51 }
 0x1f1   : > { %887 = vrcp.f32 %v1284_v52  ;;  %v1290_v59 = vadd.f32 1.0, %v882_v55  ;;  %v512_v62 = vsel %vm509_vm6, %v511_v56, %v507_v60  ;;  %v567_v3 = vsel %vm1305_vm11, %v1276_v32, %v563_v4  ;;  %vm521_vm14 = vmor %vm519_vm13, %vm520_vm9 }
 0x1f2   : > { %v1293_v61 = vpop.eup %883  ;;  %889 = vpow2.f32 %v489_v50  ;;  %v516_v63 = vsub.f32 1.0, %v515_v57  ;;  %621 = vperm.xlu1 %860, %v512_v62   ;;  %v526_v30 = vor.u32 1.1754944e-38, %v525_v11  ;;  %v583_v31 = vand.u32 2147483647, %v1279_v37 }
 0x1f3   : > { %891 = vrcp.f32 %v1290_v59  ;;  %v575_v16 = vmul.f32 %v1293_v61, %v1279_v37  ;;  %v572_v41 = vsel %vm1309_vm12, %v571_v33, %v567_v3  ;;  %vm580_vm0 = vweird.f32 %v1293_v61 }
 0x1f4   : > { %v517_v13 = vmul.f32 %v880_v51, %v516_v63  ;;  %v538_v45 = vand.u32 2147483647, %v1284_v52  ;;  %v540_v46 = vand.u32 2147483648, %v1284_v52  ;;  %vm534_vm3 = vweird.f32 %v1284_v52  ;;  %vm1336_vm4 = vmor %vm579_vm2, %vm580_vm0 }
 0x1f5   : > { %v576_v25 = vsub.f32 1.0, %v575_v16  ;;  %v600_v53 = vand.u32 2147483648, %v1290_v59  ;;  %vm584_vm8 = vcmp.eq.f32.partialorder %v583_v31, 8.507059e+37  ;;  %vm594_vm9 = vweird.f32 %v1290_v59 }
 0x1f6   : > { %v886_v23 = vpop.eup %885  ;;  %v518_v24 = vadd.f32 %v880_v51, %v517_v13  ;;  %vm539_vm7 = vcmp.eq.f32.partialorder %v538_v45, 8.507059e+37  ;;  %v541_v37 = vor.u32 1.1754944e-38, %v540_v46 }
 0x1f7   : > { %v888_v28 = vpop.eup %887  ;;  %v1317_v29 = vadd.f32 1.0, %v886_v23  ;;  %v577_v38 = vmul.f32 %v1293_v61, %v576_v25  ;;  %v601_v11 = vor.u32 1.1754944e-38, %v600_v53 }
 0x1f8   : > { %v890_v34 = vpop.eup %889  ;;  %v522_v35 = vsel %vm521_vm14, %v880_v51, %v518_v24  ;;  %v530_v36 = vmul.f32 %v888_v28, %v1284_v52  ;;  %vm535_vm1 = vweird.f32 %v888_v28  ;;  %v598_v51 = vand.u32 2147483647, %v1290_v59 }
 0x1f9   : > { %v892_v39 = vpop.eup %891  ;;  %893 = vrcp.f32 %v1317_v29  ;;  %v1323_v32 = vadd.f32 1.0, %v890_v34  ;;  %v527_v40 = vsel %vm524_vm15, %v526_v30, %v522_v35  ;;  %v578_v43 = vadd.f32 %v1293_v61, %v577_v38  ;;  %vm536_vm6 = vmor %vm534_vm3, %vm535_vm1 }
 0x1fa   : > { %626 = vperm.xlu2 %861, %v527_v40   ;;  %v531_v42 = vsub.f32 1.0, %v530_v36  ;;  %v590_v44 = vmul.f32 %v892_v39, %v1290_v59  ;;  %641 = vperm.xlu1 %860, %v572_v41   ;;  %vm595_vm5 = vweird.f32 %v892_v39  ;;  %v586_v52 = vor.u32 1.1754944e-38, %v585_v47 }
 0x1fb   : > { %895 = vrcp.f32 %v1323_v32  ;;  %v582_v55 = vsel %vm1336_vm4, %v1293_v61, %v578_v43  ;;  %vm596_vm10 = vmor %vm594_vm9, %vm595_vm5  ;;  %vm599_vm11 = vcmp.eq.f32.partialorder %v598_v51, 8.507059e+37  ;;  %vm549_vm12 = vweird.f32 %v1317_v29 }
 0x1fc   : > { %v532_v48 = vmul.f32 %v888_v28, %v531_v42  ;;  %v591_v49 = vsub.f32 1.0, %v590_v44  ;;  %v587_v6 = vsel %vm584_vm8, %v586_v52, %v582_v55  ;;  %v555_v17 = vand.u32 2147483648, %v1317_v29 }
 0x1fd   : > { %v553_v18 = vand.u32 2147483647, %v1317_v29  ;;  %vm609_vm0 = vweird.f32 %v1323_v32  ;;  %v615_v33 = vand.u32 2147483648, %v1323_v32  ;;  %v613_v35 = vand.u32 2147483647, %v1323_v32 }
 0x1fe   : > { %v533_v54 = vadd.f32 %v888_v28, %v532_v48  ;;  %v592_v56 = vmul.f32 %v892_v39, %v591_v49  ;;  %v556_v25 = vor.u32 1.1754944e-38, %v555_v17 }
 0x1ff   : > { %v894_v57 = vpop.eup %893  ;;  %vm554_vm15 = vcmp.eq.f32.partialorder %v553_v18, 8.507059e+37  ;;  %vm614_vm3 = vcmp.eq.f32.partialorder %v613_v35, 8.507059e+37 }
 0x200   : > { %v537_v58 = vsel %vm536_vm6, %v888_v28, %v533_v54  ;;  %v593_v60 = vadd.f32 %v892_v39, %v592_v56  ;;  %v545_v62 = vmul.f32 %v894_v57, %v1317_v29  ;;  %vm550_vm13 = vweird.f32 %v894_v57 }
 0x201   : > { %v896_v63 = vpop.eup %895  ;;  %v542_v4 = vsel %vm539_vm7, %v541_v37, %v537_v58  ;;  %vm551_vm14 = vmor %vm549_vm12, %vm550_vm13  ;;  %v616_v29 = vor.u32 1.1754944e-38, %v615_v33 }
 0x202   : > { %631 = vperm.xlu0 %862, %v542_v4   ;;  %646 = vperm.xlu2 %861, %v587_v6   ;;  %v597_v61 = vsel %vm596_vm10, %v892_v39, %v593_v60  ;;  %v546_v12 = vsub.f32 1.0, %v545_v62  ;;  %v605_v13 = vmul.f32 %v896_v63, %v1323_v32  ;;  %vm610_vm1 = vweird.f32 %v896_v63 }
 0x203   : > { %v602_v16 = vsel %vm599_vm11, %v601_v11, %v597_v61  ;;  %vm611_vm2 = vmor %vm609_vm0, %vm610_vm1 }
 0x204   : > { %651 = vperm.xlu1 %860, %v602_v16   ;;  %v547_v59 = vmul.f32 %v894_v57, %v546_v12  ;;  %v606_v23 = vsub.f32 1.0, %v605_v13 }
 0x206   : > { %v548_v24 = vadd.f32 %v894_v57, %v547_v59  ;;  %v607_v3 = vmul.f32 %v896_v63, %v606_v23 }
 0x208   : > { %v552_v28 = vsel %vm551_vm14, %v894_v57, %v548_v24  ;;  %v608_v34 = vadd.f32 %v896_v63, %v607_v3 }
 0x209   : > { %v557_v30 = vsel %vm554_vm15, %v556_v25, %v552_v28 }
 0x20a   : > { %636 = vperm.xlu2 %861, %v557_v30   ;;  %v612_v36 = vsel %vm611_vm2, %v896_v63, %v608_v34 }
 0x20b   : > { %v617_v38 = vsel %vm614_vm3, %v616_v29, %v612_v36 }
 0x212   : > { %656 = vperm.xlu2 %861, %v617_v38  }
 0x254   : > { %v627_v31 = vpop.permute.xlu2 %626 }
 0x255   : > { %v661_v39 = vmul.f32 %v627_v31, %v1184_v21  ;;  %v662_v40 = vmul.f32 %v627_v31, %v1187_v22 }
 0x257   : > { %677 = vst [vmem:[%s1358_s9 + $0x10] sm:$0xff] %v661_v39 }
 0x258   : > { %678 = vst [vmem:[%s1358_s9 + $0x18] sm:$0xff] %v662_v40 }
 0x25c   : > { %v647_v32 = vpop.permute.xlu2 %646 }
 0x25d   : > { %v669_v41 = vmul.f32 %v647_v32, %v1148_v7  ;;  %v670_v21 = vmul.f32 %v647_v32, %v1151_v8 }
 0x25f   : > { %685 = vst [vmem:[%s1358_s9 + $0x50] sm:$0xff] %v669_v41 }
 0x260   : > { %686 = vst [vmem:[%s1358_s9 + $0x58] sm:$0xff] %v670_v21 }
 0x264   : > { %v637_v22 = vpop.permute.xlu2 %636  ;;  %v622_v44 = vpop.permute.xlu1 %621 }
 0x265   : > { %v665_v42 = vmul.f32 %v637_v22, %v1166_v14  ;;  %v666_v43 = vmul.f32 %v637_v22, %v1169_v15  ;;  %v659_v45 = vmul.f32 %v622_v44, %v1196_v26  ;;  %v660_v46 = vmul.f32 %v622_v44, %v1199_v27 }
 0x267   : > { %681 = vst [vmem:[%s1358_s9 + $0x30] sm:$0xff] %v665_v42 }
 0x268   : > { %682 = vst [vmem:[%s1358_s9 + $0x38] sm:$0xff] %v666_v43 }
 0x269   : > { %675 = vst [vmem:[%s1358_s9] sm:$0xff] %v659_v45 }
 0x26a   : > { %676 = vst [vmem:[%s1358_s9 + $0x8] sm:$0xff] %v660_v46 }
 0x26c   : > { %v657_v7 = vpop.permute.xlu2 %656  ;;  %v642_v15 = vpop.permute.xlu1 %641 }
 0x26d   : > { %v673_v8 = vmul.f32 %v657_v7, %v1130_v0  ;;  %v674_v14 = vmul.f32 %v657_v7, %v1133_v1  ;;  %v667_v47 = vmul.f32 %v642_v15, %v1154_v9  ;;  %v668_v48 = vmul.f32 %v642_v15, %v1157_v10 }
 0x26f   : > { %689 = vst [vmem:[%s1358_s9 + $0x70] sm:$0xff] %v673_v8 }
 0x270   : > { %690 = vst [vmem:[%s1358_s9 + $0x78] sm:$0xff] %v674_v14 }
 0x271   : > { %683 = vst [vmem:[%s1358_s9 + $0x40] sm:$0xff] %v667_v47 }
 0x272   : > { %684 = vst [vmem:[%s1358_s9 + $0x48] sm:$0xff] %v668_v48 }
 0x274   : > { %v632_v0 = vpop.permute.xlu0 %631 }
 0x275   : > { %v663_v1 = vmul.f32 %v632_v0, %v1178_v19  ;;  %v664_v9 = vmul.f32 %v632_v0, %v1181_v20 }
 0x276   : > { %v652_v10 = vpop.permute.xlu1 %651 }
 0x277   : > { %679 = vst [vmem:[%s1358_s9 + $0x20] sm:$0xff] %v663_v1  ;;  %v671_v26 = vmul.f32 %v652_v10, %v1136_v2  ;;  %v672_v27 = vmul.f32 %v652_v10, %v1143_v5 }
 0x278   : > { %680 = vst [vmem:[%s1358_s9 + $0x28] sm:$0xff] %v664_v9 }
 0x279   : > { %687 = vst [vmem:[%s1358_s9 + $0x60] sm:$0xff] %v671_v26 }
 0x27a   : > { %688 = vst [vmem:[%s1358_s9 + $0x68] sm:$0xff] %v672_v27 }
 0x27b   : > { %954 = shalt.err (!%p951_p4)
}
 0x27c   : > { %s999_s12 = smov 256   ;;  %s1000_s28 = smov 16  }
 0x27d   : > { %810 = dma.vmem_to_hbm [thread:$0]  (%p1081_p11), %s705_s23, 2048, %s707_s25, %s692_s22, %s999_s12, %s999_s12, %s1000_s28  }
 0x27e PF: > { %s721_s9 = sand.u32 1, %s981_s18   ;;  %p1441_p7 = scmp.ge.s32.totalorder %s993_s21, 2 }
 0x27f   : > { %s722_s14 = scalar_lea.sflag [#allocation4], %s721_s9 }
 0x280   : > { %p817_p5 = pnand %p1441_p7, %p1085_p12 }
 0x282   : > { %p818_p8 = pneg %p817_p5 }
 0x284   : > { %976 = dma.done.wait (%p818_p8), %s722_s14, 2048  }
 0x285   : > { %978 = vsyncadd (%p818_p8), %s722_s14, 4294965248  ;;  %p18_p10 = scmp.ge.s32.totalorder %s1056_s24, 4   ;;  %s1442_s18 = smov %s985_s19 }
 0x286   : > { %s1443_s19 = smov %s989_s20  ;;  %s1444_s20 = smov %s1068_s27 }
 0x287   : > { %s1445_s21 = smov %s1056_s24  ;;  %20 = sbr.rel (!%p18_p10) target bundleno = 5 (0x5), region = 85 }
 0x28c   :  { %728 = vsyncpa [#allocation3], 1 }
 0x28d   :  { %730 = vsyncpa [#allocation3 + $0x1], 1 }
 0x28e   :  { %731 = vsyncpa [#allocation4], 1 }
 0x28f   :  { %733 = vsyncpa [#allocation4 + $0x1], 1 }

</bundles_post_ra>
